<compile_context>
chip_gen: v7x
topology: tpu7x:2x2x1
jax: 0.10.0
libtpu: 0.0.40
codegen_flags: <defaults>
</compile_context>

<pallas_src>
import jax
import jax.numpy as jnp
from jax.experimental import pallas as pl
from jax.experimental.pallas import tpu as pltpu

LANE = 128  # TPU vreg lane width


def _round_up(x, m):
    return (x + m - 1) // m * m


def mlp_kernel(x_ref, w1_ref, b1_ref, w2_ref, b2_ref, out_ref):
    # hidden = relu(x @ W1 + b1)   -- all in f32, h stays on-chip
    h = jnp.dot(x_ref[...], w1_ref[...], preferred_element_type=jnp.float32)
    h = jnp.maximum(h + b1_ref[...], 0.0)          # (tm, Hp) + (1, Hp) broadcast
    # out = hidden @ W2 + b2
    y = jnp.dot(h, w2_ref[...], preferred_element_type=jnp.float32)
    out_ref[...] = (y + b2_ref[...]).astype(out_ref.dtype)


def pad_mlp_params(w1, b1, w2, b2):
    """One-time zero-padding of hidden/output feature dims to 128-lane multiples.

    Zero columns of W1/b1 give relu(0)=0 hidden lanes; zero rows/cols of W2/b2
    contribute 0, so slicing the padded output reproduces the exact result.
    """
    in_f, hidden = w1.shape
    _, out_f = w2.shape
    hp = _round_up(hidden, LANE)
    op = _round_up(out_f, LANE)
    w1p = jnp.pad(w1, ((0, 0), (0, hp - hidden)))
    b1p = jnp.pad(b1, ((0, 0), (0, hp - hidden)))
    w2p = jnp.pad(w2, ((0, hp - hidden), (0, op - out_f)))
    b2p = jnp.pad(b2, ((0, 0), (0, op - out_f)))
    return w1p, b1p, w2p, b2p


def mlp_forward(x, w1p, b1p, w2p, b2p, out_features, *, block_b=128):
    """x: [B, in]; padded params from pad_mlp_params. Returns [B, out_features] f32."""
    B, K = x.shape
    Hp = w1p.shape[1]
    Np = w2p.shape[1]

    # Row tile: MXU/sublane-filling 128 when possible, else one padded-to-8 tile.
    tm = block_b if B >= block_b else _round_up(B, 8)
    Bp = _round_up(B, tm)
    if Bp != B:
        x = jnp.pad(x, ((0, Bp - B), (0, 0)))

    out_padded = pl.pallas_call(
        mlp_kernel,
        out_shape=jax.ShapeDtypeStruct((Bp, Np), jnp.float32),
        grid=(Bp // tm,),
        in_specs=[
            pl.BlockSpec((tm, K), lambda i: (i, 0)),   # batch tile of activations
            pl.BlockSpec((K, Hp), lambda i: (0, 0)),   # weights resident across grid
            pl.BlockSpec((1, Hp), lambda i: (0, 0)),
            pl.BlockSpec((Hp, Np), lambda i: (0, 0)),
            pl.BlockSpec((1, Np), lambda i: (0, 0)),
        ],
        out_specs=pl.BlockSpec((tm, Np), lambda i: (i, 0)),  # lane-dense (Np % 128 == 0)
        compiler_params=pltpu.CompilerParams(
            dimension_semantics=("parallel",),
            vmem_limit_bytes=32 * 1024 * 1024,
        ),
    )(x, w1p, b1p, w2p, b2p)

    # Strip batch / feature padding.
    return out_padded[:B, :out_features]


def init_mlp_params(key, input_size, hidden_size, output_size):
    """PyTorch-style init: uniform(-1/sqrt(fan_in), 1/sqrt(fan_in)), weights stored [in, out]."""
    k1, k2, k3, k4 = jax.random.split(key, 4)
    bound1 = 1.0 / (input_size ** 0.5)
    bound2 = 1.0 / (hidden_size ** 0.5)
    w1 = jax.random.uniform(k1, (input_size, hidden_size), jnp.float32, -bound1, bound1)
    b1 = jax.random.uniform(k2, (1, hidden_size), jnp.float32, -bound1, bound1)
    w2 = jax.random.uniform(k3, (hidden_size, output_size), jnp.float32, -bound2, bound2)
    b2 = jax.random.uniform(k4, (1, output_size), jnp.float32, -bound2, bound2)
    return w1, b1, w2, b2


if __name__ == "__main__":
    input_size, hidden_size, output_size = 16, 32, 8

    key = jax.random.PRNGKey(0)
    kx, kp = jax.random.split(key)
    w1, b1, w2, b2 = init_mlp_params(kp, input_size, hidden_size, output_size)
    # One-time padding outside the kernel (no per-call padding of weights).
    w1p, b1p, w2p, b2p = pad_mlp_params(w1, b1, w2, b2)

    ok = True
    # Two batch sizes: one exercising the tm=128 grid path, one the small-batch path.
    for batch in (256, 8):
        x = jax.random.normal(kx, (batch, input_size), jnp.float32)
        out = jax.block_until_ready(mlp_forward(x, w1p, b1p, w2p, b2p, output_size))
        ref = jnp.maximum(x @ w1 + b1, 0.0) @ w2 + b2
        ok = ok and (out.shape == (batch, output_size))
        ok = ok and bool(jnp.allclose(out, ref, atol=1e-5, rtol=1e-5))

    assert ok
    print("KERNEL_OK")
</pallas_src>

<mosaic_0001>
module attributes {stable_mosaic.version = 11 : i64} {
  func.func @mlp_kernel(%arg0: i32, %arg1: memref<128x16xf32, #tpu.memory_space<vmem>>, %arg2: memref<16x128xf32, #tpu.memory_space<vmem>>, %arg3: memref<1x128xf32, #tpu.memory_space<vmem>>, %arg4: memref<128x128xf32, #tpu.memory_space<vmem>>, %arg5: memref<1x128xf32, #tpu.memory_space<vmem>>, %arg6: memref<128x128xf32, #tpu.memory_space<vmem>>) attributes {dimension_semantics = [#tpu.dimension_semantics<parallel>], iteration_bounds = array<i64: 2>, scalar_prefetch = 0 : i64, scratch_operands = 0 : i64, tpu.core_type = #tpu.core_type<tc>, window_params = [{transform_indices = @transform_0, window_bounds = array<i64: 128, 16>}, {pipeline_mode = #tpu.pipeline_mode<synchronous>, transform_indices = @transform_1, window_bounds = array<i64: 16, 128>}, {pipeline_mode = #tpu.pipeline_mode<synchronous>, transform_indices = @transform_2, window_bounds = array<i64: 1, 128>}, {pipeline_mode = #tpu.pipeline_mode<synchronous>, transform_indices = @transform_3, window_bounds = array<i64: 128, 128>}, {pipeline_mode = #tpu.pipeline_mode<synchronous>, transform_indices = @transform_4, window_bounds = array<i64: 1, 128>}, {transform_indices = @transform_5, window_bounds = array<i64: 128, 128>}]} {
    %c0 = arith.constant 0 : index
    %c0_0 = arith.constant 0 : index
    %0 = vector.load %arg1[%c0, %c0_0] : memref<128x16xf32, #tpu.memory_space<vmem>>, vector<128x16xf32>
    %c0_1 = arith.constant 0 : index
    %c0_2 = arith.constant 0 : index
    %1 = vector.load %arg2[%c0_1, %c0_2] : memref<16x128xf32, #tpu.memory_space<vmem>>, vector<16x128xf32>
    %cst = arith.constant dense<0.000000e+00> : vector<128x128xf32>
    %2 = tpu.matmul %0, %1, %cst {dimension_numbers = #tpu.dot_dimension_numbers<[1], [0], [0], [1], [0, 0, 1, 1], [], []>} : vector<128x16xf32>, vector<16x128xf32>, vector<128x128xf32> -> vector<128x128xf32>
    %c0_3 = arith.constant 0 : index
    %c0_4 = arith.constant 0 : index
    %3 = vector.load %arg3[%c0_3, %c0_4] : memref<1x128xf32, #tpu.memory_space<vmem>>, vector<1x128xf32>
    %4 = vector.broadcast %3 : vector<1x128xf32> to vector<128x128xf32>
    %5 = arith.addf %2, %4 : vector<128x128xf32>
    %cst_5 = arith.constant 0.000000e+00 : f32
    %6 = vector.broadcast %cst_5 : f32 to vector<128x128xf32>
    %7 = arith.maximumf %5, %6 : vector<128x128xf32>
    %c0_6 = arith.constant 0 : index
    %c0_7 = arith.constant 0 : index
    %8 = vector.load %arg4[%c0_6, %c0_7] : memref<128x128xf32, #tpu.memory_space<vmem>>, vector<128x128xf32>
    %cst_8 = arith.constant dense<0.000000e+00> : vector<128x128xf32>
    %9 = tpu.matmul %7, %8, %cst_8 {dimension_numbers = #tpu.dot_dimension_numbers<[1], [0], [0], [1], [0, 0, 1, 1], [], []>} : vector<128x128xf32>, vector<128x128xf32>, vector<128x128xf32> -> vector<128x128xf32>
    %c0_9 = arith.constant 0 : index
    %c0_10 = arith.constant 0 : index
    %10 = vector.load %arg5[%c0_9, %c0_10] : memref<1x128xf32, #tpu.memory_space<vmem>>, vector<1x128xf32>
    %11 = vector.broadcast %10 : vector<1x128xf32> to vector<128x128xf32>
    %12 = arith.addf %9, %11 : vector<128x128xf32>
    %c0_11 = arith.constant 0 : index
    %c0_12 = arith.constant 0 : index
    %13 = vector.load %arg6[%c0_11, %c0_12] : memref<128x128xf32, #tpu.memory_space<vmem>>, vector<128x128xf32>
    tpu.vector_store %arg6[%c0_11, %c0_12], %12 {strides = array<i32>} : memref<128x128xf32, #tpu.memory_space<vmem>>, vector<128x128xf32>,
    return
  }
  func.func @transform_0(%arg0: i32) -> (i32, i32) {
    %c0_i32 = arith.constant 0 : i32
    %c0_i32_0 = arith.constant 0 : i32
    return %arg0, %c0_i32 : i32, i32
  }
  func.func @transform_1(%arg0: i32) -> (i32, i32) {
    %c0_i32 = arith.constant 0 : i32
    %c0_i32_0 = arith.constant 0 : i32
    %c0_i32_1 = arith.constant 0 : i32
    return %c0_i32, %c0_i32_0 : i32, i32
  }
  func.func @transform_2(%arg0: i32) -> (i32, i32) {
    %c0_i32 = arith.constant 0 : i32
    %c0_i32_0 = arith.constant 0 : i32
    %c0_i32_1 = arith.constant 0 : i32
    return %c0_i32, %c0_i32_0 : i32, i32
  }
  func.func @transform_3(%arg0: i32) -> (i32, i32) {
    %c0_i32 = arith.constant 0 : i32
    %c0_i32_0 = arith.constant 0 : i32
    %c0_i32_1 = arith.constant 0 : i32
    return %c0_i32, %c0_i32_0 : i32, i32
  }
  func.func @transform_4(%arg0: i32) -> (i32, i32) {
    %c0_i32 = arith.constant 0 : i32
    %c0_i32_0 = arith.constant 0 : i32
    %c0_i32_1 = arith.constant 0 : i32
    return %c0_i32, %c0_i32_0 : i32, i32
  }
  func.func @transform_5(%arg0: i32) -> (i32, i32) {
    %c0_i32 = arith.constant 0 : i32
    %c0_i32_0 = arith.constant 0 : i32
    return %arg0, %c0_i32 : i32, i32
  }
}

</mosaic_0001>

<bundles_post_ra>
// kernel: tpu_custom_call.1
= control target key start
LH: loop header
LB: loop body
LE: loop exit
PB: predicated region body
PF: predicated region fallthrough
CT: control target
= control target key end

     0   :  { %10 = vsyncpa [#allocation3], 0  ;;  %s1295_s0 = inlined_call_operand.vmem [shape: f32[256,16], index: 0, kind: input, shape index: {}]   ;;  %s1296_s1 = inlined_call_operand.vmem [shape: f32[16,128], index: 1, kind: input, shape index: {}]   ;;  %s1297_s2 = inlined_call_operand.vmem [shape: f32[1,128], index: 2, kind: input, shape index: {}]   ;;  %s1298_s3 = inlined_call_operand.vmem [shape: f32[128,128], index: 3, kind: input, shape index: {}]   ;;  %s1299_s4 = inlined_call_operand.vmem [shape: f32[1,128], index: 4, kind: input, shape index: {}]   ;;  %s1300_s5 = inlined_call_operand.hbm [shape: f32[256,128], index: 5, kind: output, shape index: {}]  }
   0x1   :  { %12 = vsyncpa [#allocation3 + $0x1], 0  ;;  %s1076_s18 = smov 0   ;;  %s1078_s19 = smov 0  }
   0x2   :  { %s1080_s20 = smov 0   ;;  %s1082_s21 = smov 0  }
   0x3 LB: > { %s1097_s22 = sadd.s32 4294967295, %s1041_s21   ;;  %s721_s23 = sadd.s32 4294967294, %s1041_s21   ;;  %s1041_s21 = sphi %s1082_s21, %s1306_s21   ;;  %s1037_s20 = sphi %s1080_s20, %s1305_s20   ;;  %s1033_s19 = sphi %s1078_s19, %s1304_s19   ;;  %s1029_s18 = sphi %s1076_s18, %s1303_s18  }
   0x4   : > { %s1101_s24 = sadd.s32 1, %s1041_s21   ;;  %s135_s25 = sadd.s32 1, %s1037_s20 }
   0x5   : > { %s132_s26 = ssub.s32 %s1041_s21, %s1101_s24  ;;  %p145_p0 = scmp.ne.s32.totalorder %s1037_s20, %s1033_s19 }
   0x6   : > { %p133_p1 = scmp.eq.s32.totalorder %s132_s26, 0  ;;  %p146_p2 = scmp.eq.s32.totalorder %s1097_s22, 1 }
   0x7   : > { %p151_p3 = scmp.ne.s32.totalorder %s1033_s19, %s1029_s18  ;;  %p152_p4 = scmp.eq.s32.totalorder %s721_s23, 1 }
   0x8   : > { %s1112_s27 = scalar_select %p133_p1, %s1037_s20, %s135_s25  }
   0x9   : > { %p1114_p5 = por %p146_p2, %p145_p0  ;;  %p1118_p6 = por %p152_p4, %p151_p3 }
   0xa   : > { %p724_p7 = scmp.ge.s32.totalorder %s1041_s21, 1  ;;  %p191_p8 = scmp.lt.s32.totalorder %s1041_s21, 3 }
   0xc   : > { %p192_p9 = pnand %p724_p7, %p191_p8 }
   0xd   : > { %v242_v0 = vld [vmem:[%s1296_s1] sm:$0xff] (!%p192_p9)  ;;  %v243_v1 = vld [vmem:[%s1296_s1 + $0x8] sm:$0xff] (!%p192_p9)  ;;  %s726_s9 = sshll.u32 (!%p192_p9), %s1097_s22, 4  ;;  %v463_v5 = vld [vmem:[%s1298_s3 + $0x10] sm:$0xff] (!%p192_p9)  ;;  %vm251_vm0 = vcmask (!%p192_p9), 130048   ;;  %s751_s6 = sshll.u32 (!%p192_p9), %s1097_s22, 11 }
   0xe   : > { %195 = sbr.rel (%p192_p9) target bundleno = 502 (0x1f6), region = 40  ;;  %v461_v2 = vld [vmem:[%s1298_s3] sm:$0xff] (!%p192_p9)  ;;  %v886_v3 = vpack.c.bf16 (!%p192_p9), %v243_v1, %v242_v0  ;;  %p220_p10 = scmp.lt.s32.totalorder (!%p192_p9), %s726_s9, 31  ;;  %v462_v4 = vld [vmem:[%s1298_s3 + $0x8] sm:$0xff] (!%p192_p9)  ;;  %v464_v6 = vld [vmem:[%s1298_s3 + $0x18] sm:$0xff] (!%p192_p9) }
   0xf   : > { %v890_v7 = vpack.c.bf16 (!%p192_p9), %v462_v4, %v461_v2  ;;  %v894_v8 = vpack.c.bf16 (!%p192_p9), %v464_v6, %v463_v5  ;;  %v465_v9 = vld [vmem:[%s1298_s3 + $0x20] sm:$0xff] (!%p192_p9)  ;;  %v466_v10 = vld [vmem:[%s1298_s3 + $0x28] sm:$0xff] (!%p192_p9)  ;;  %v467_v16 = vld [vmem:[%s1298_s3 + $0x30] sm:$0xff] (!%p192_p9)  ;;  %s1043_s12 = smov (!%p192_p9), [#allocation2]  }
  0x10   : > { %887 = vmatprep.subr.bf16.mxu0 (!%p192_p9), %v886_v3  ;;  %v898_v14 = vpack.c.bf16 (!%p192_p9), %v466_v10, %v465_v9  ;;  %v468_v17 = vld [vmem:[%s1298_s3 + $0x38] sm:$0xff] (!%p192_p9)  ;;  %v469_v21 = vld [vmem:[%s1298_s3 + $0x40] sm:$0xff] (!%p192_p9)  ;;  %v470_v22 = vld [vmem:[%s1298_s3 + $0x48] sm:$0xff] (!%p192_p9)  ;;  %s983_s13 = sshll.u32 (!%p192_p9), %s1043_s12, 4  ;;  %s984_s13 = int_to_ptr.vmem [resolvable:$false] %s983_s13 }
  0x11   : > { %889 = vmatpush3.bf16.msra.mxu0 (!%p192_p9), %v886_v3  ;;  %922 = vmatprep.subr.bf16.mxu1 (!%p192_p9), %v890_v7  ;;  %v902_v19 = vpack.c.bf16 (!%p192_p9), %v468_v17, %v467_v16  ;;  %v906_v24 = vpack.c.bf16 (!%p192_p9), %v470_v22, %v469_v21  ;;  %v471_v26 = vld [vmem:[%s1298_s3 + $0x50] sm:$0xff] (!%p192_p9)  ;;  %v472_v27 = vld [vmem:[%s1298_s3 + $0x58] sm:$0xff] (!%p192_p9)  ;;  %v473_v31 = vld [vmem:[%s1298_s3 + $0x60] sm:$0xff] (!%p192_p9)  ;;  %s985_s14 = scalar_lea.vmem (!%p192_p9), %s984_s13, 4096 }
  0x12   : > { %891 = vmatprep.subr.bf16.mxu0 (!%p192_p9), %v890_v7  ;;  %930 = vmatpush3.bf16.msra.mxu1 (!%p192_p9), %v890_v7  ;;  %v910_v29 = vpack.c.bf16 (!%p192_p9), %v472_v27, %v471_v26  ;;  %v474_v32 = vld [vmem:[%s1298_s3 + $0x68] sm:$0xff] (!%p192_p9)  ;;  %v475_v40 = vld [vmem:[%s1298_s3 + $0x70] sm:$0xff] (!%p192_p9)  ;;  %v476_v41 = vld [vmem:[%s1298_s3 + $0x78] sm:$0xff] (!%p192_p9) }
  0x13   : > { %923 = vmatprep.subr.bf16.mxu1 (!%p192_p9), %v894_v8  ;;  %v914_v34 = vpack.c.bf16 (!%p192_p9), %v474_v32, %v473_v31  ;;  %v918_v42 = vpack.c.bf16 (!%p192_p9), %v476_v41, %v475_v40  ;;  %v728_v43 = vld [vmem:[%s1297_s2] ss:$0 sm:$0xff] (!%p192_p9) }
  0x15   : > { %s1308_s9 = smov (!%p220_p10, %s726_s9), 31 }
  0x16   : > { %s727_s23 = sshll.u32 %s1308_s9, 3  ;;  %931 = vmatpush3.bf16.msra.mxu1 %v894_v8  ;;  %s1246_s9 = scalar_lea.hbm %s1300_s5, %s751_s6 }
  0x17   : > { %s1146_s30 = scalar_lea.vmem %s1295_s0, %s727_s23  ;;  %924 = vmatprep.subr.bf16.mxu1 %v898_v14 }
  0x18   : > { %v226_v11 = vld [vmem:[%s1146_s30] sm:$0xff]  ;;  %v227_v12 = vld [vmem:[%s1146_s30 + $0x8] sm:$0xff]  ;;  %v228_v13 = vld [vmem:[%s1146_s30 + $0x10] sm:$0xff] }
  0x19   : > { %806 = vmatprep.mubr.msk.f32.mxu0 %vm251_vm0, %v226_v11  ;;  %v229_v15 = vld [vmem:[%s1146_s30 + $0x18] sm:$0xff]  ;;  %v230_v18 = vld [vmem:[%s1146_s30 + $0x20] sm:$0xff]  ;;  %v231_v20 = vld [vmem:[%s1146_s30 + $0x28] sm:$0xff] }
  0x1a   : > { %807 = vmatmul.mubr.msk.f32.vlgmr.msra.gmra.mrb[0].mxu0 %vm251_vm0, %v227_v12  ;;  %932 = vmatpush3.bf16.msra.mxu1 %v898_v14  ;;  %v232_v23 = vld [vmem:[%s1146_s30 + $0x30] sm:$0xff]  ;;  %v233_v25 = vld [vmem:[%s1146_s30 + $0x38] sm:$0xff]  ;;  %v234_v28 = vld [vmem:[%s1146_s30 + $0x40] sm:$0xff] }
  0x1b   : > { %809 = vmatprep.mubr.msk.f32.mxu0 %vm251_vm0, %v228_v13  ;;  %893 = vmatpush3.bf16.msra.mxu0 %v890_v7  ;;  %v235_v30 = vld [vmem:[%s1146_s30 + $0x48] sm:$0xff]  ;;  %v236_v33 = vld [vmem:[%s1146_s30 + $0x50] sm:$0xff]  ;;  %v237_v35 = vld [vmem:[%s1146_s30 + $0x58] sm:$0xff] }
  0x1c   : > { %895 = vmatprep.subr.bf16.mxu0 %v894_v8  ;;  %925 = vmatprep.subr.bf16.mxu1 %v902_v19  ;;  %v238_v36 = vld [vmem:[%s1146_s30 + $0x60] sm:$0xff]  ;;  %v239_v37 = vld [vmem:[%s1146_s30 + $0x68] sm:$0xff]  ;;  %v240_v38 = vld [vmem:[%s1146_s30 + $0x70] sm:$0xff] }
  0x1d   : > { %v241_v39 = vld [vmem:[%s1146_s30 + $0x78] sm:$0xff]  ;;  %s216_s30 = sand.u32 1, %s1033_s19  }
  0x1e   : > { %810 = vmatmul.mubr.msk.f32.gmra.mrb[2].mxu0 %vm251_vm0, %v229_v15  ;;  %933 = vmatpush3.bf16.msra.mxu1 %v902_v19  ;;  %s725_s17 = sshll.u32 %s216_s30, 7  ;;  %s1254_s22 = scalar_lea.sflag [#allocation3], %s216_s30 }
  0x1f   : > { %812 = vmatprep.mubr.msk.f32.mxu0 %vm251_vm0, %v230_v18  ;;  %897 = vmatpush3.bf16.msra.mxu0 %v894_v8  ;;  %s1225_s26 = scalar_lea.vmem [#allocation2], %s725_s17 }
  0x20   : > { %899 = vmatprep.subr.bf16.mxu0 %v898_v14  ;;  %926 = vmatprep.subr.bf16.mxu1 %v906_v24  ;;  %s659_s7 = sshll.u32 %s1225_s26, 4  ;;  %s1248_s7 = int_to_ptr.vmem [resolvable:$true] %s659_s7 }
  0x21   : > { %s979_s11 = scalar_lea.vmem %s1248_s7, 2048  ;;  %p986_p0 = scmp.lt.s32.totalorder %s1248_s7, %s984_s13 }
  0x22   : > { %813 = vmatmul.mubr.msk.f32.gmra.mrb[4].mxu0 %vm251_vm0, %v231_v20  ;;  %934 = vmatpush3.bf16.msra.mxu1 %v906_v24  ;;  %p980_p11 = scmp.ne.s32.totalorder %s1248_s7, %s979_s11  ;;  %p987_p1 = scmp.lt.s32.totalorder %s985_s14, %s979_s11 }
  0x23   : > { %815 = vmatprep.mubr.msk.f32.mxu0 %vm251_vm0, %v232_v23  ;;  %901 = vmatpush3.bf16.msra.mxu0 %v898_v14 }
  0x24   : > { %903 = vmatprep.subr.bf16.mxu0 %v902_v19  ;;  %927 = vmatprep.subr.bf16.mxu1 %v910_v29  ;;  %p981_p12 = pnand %p980_p11, %p1114_p5  ;;  %p988_p2 = por %p987_p1, %p986_p0 }
  0x26   : > { %816 = vmatmul.mubr.msk.f32.gmra.mrb[6].mxu0 %vm251_vm0, %v233_v25  ;;  %935 = vmatpush3.bf16.msra.mxu1 %v910_v29  ;;  %p982_p13 = pneg %p981_p12 }
  0x27   : > { %818 = vmatprep.mubr.msk.f32.mxu0 %vm251_vm0, %v234_v28  ;;  %905 = vmatpush3.bf16.msra.mxu0 %v902_v19  ;;  %v745_v28 = vld [vmem:[%s1299_s4] ss:$0 sm:$0xff] }
  0x28   : > { %907 = vmatprep.subr.bf16.mxu0 %v906_v24  ;;  %928 = vmatprep.subr.bf16.mxu1 %v914_v34  ;;  %p989_p3 = pnand %p988_p2, %p982_p13 }
  0x2a   : > { %819 = vmatmul.mubr.msk.f32.gmra.mrb[8].mxu0 %vm251_vm0, %v235_v30  ;;  %936 = vmatpush3.bf16.msra.mxu1 %v914_v34 }
  0x2b   : > { %821 = vmatprep.mubr.msk.f32.mxu0 %vm251_vm0, %v236_v33  ;;  %909 = vmatpush3.bf16.msra.mxu0 %v906_v24 }
  0x2c   : > { %911 = vmatprep.subr.bf16.mxu0 %v910_v29  ;;  %929 = vmatprep.subr.bf16.mxu1 %v918_v42 }
  0x2e   : > { %822 = vmatmul.mubr.msk.f32.gmra.mrb[10].mxu0 %vm251_vm0, %v237_v35  ;;  %937 = vmatpush3.bf16.msra.mxu1 %v918_v42 }
  0x2f   : > { %824 = vmatprep.mubr.msk.f32.mxu0 %vm251_vm0, %v238_v36  ;;  %913 = vmatpush3.bf16.msra.mxu0 %v910_v29 }
  0x30   : > { %915 = vmatprep.subr.bf16.mxu0 %v914_v34 }
  0x32   : > { %825 = vmatmul.mubr.msk.f32.gmra.mrb[12].mxu0 %vm251_vm0, %v239_v37 }
  0x33   : > { %827 = vmatprep.mubr.msk.f32.mxu0 %vm251_vm0, %v240_v38  ;;  %917 = vmatpush3.bf16.msra.mxu0 %v914_v34 }
  0x34   : > { %919 = vmatprep.subr.bf16.mxu0 %v918_v42 }
  0x36   : > { %828 = vmatmul.mubr.msk.f32.gmra.mrb[14].mxu0 %vm251_vm0, %v241_v39 }
  0x37   : > { %921 = vmatpush3.bf16.msra.mxu0 %v918_v42 }
  0xed   : > { %v808_v44 = vpop.f32.mrb[0].mxu0 }
  0xee   : > { %v372_v45 = vadd.f32 %v808_v44, %v728_v43  ;;  %v366_v46 = vpop.f32.mrb[1].mxu0 }
  0xef   : > { %v367_v47 = vadd.f32 %v728_v43, %v366_v46 }
  0xf0   : > { %v446_v50 = vmax.f32 %v372_v45, 0.0 }
  0xf1   : > { %v445_v48 = vmax.f32 %v367_v47, 0.0  ;;  %v811_v49 = vpop.f32.mrb[2].mxu0 }
  0xf2   : > { %v382_v51 = vadd.f32 %v811_v49, %v728_v43  ;;  %v376_v52 = vpop.f32.mrb[3].mxu0 }
  0xf3   : > { %v377_v53 = vadd.f32 %v728_v43, %v376_v52  ;;  %862 = vmatprep.mubr.f32.mxu0 %v445_v48 }
  0xf4   : > { %863 = vmatmul.mubr.f32.vlgmr.msra.gmra.mrb[16].mxu0 %v446_v50  ;;  %v448_v56 = vmax.f32 %v382_v51, 0.0 }
  0xf5   : > { %v447_v54 = vmax.f32 %v377_v53, 0.0  ;;  %v814_v55 = vpop.f32.mrb[4].mxu0 }
  0xf6   : > { %v392_v57 = vadd.f32 %v814_v55, %v728_v43  ;;  %v386_v58 = vpop.f32.mrb[5].mxu0 }
  0xf7   : > { %v387_v59 = vadd.f32 %v728_v43, %v386_v58  ;;  %865 = vmatprep.mubr.f32.mxu0 %v447_v54 }
  0xf8   : > { %866 = vmatmul.mubr.f32.gmra.mrb[18].mxu0 %v448_v56  ;;  %v450_v62 = vmax.f32 %v392_v57, 0.0 }
  0xf9   : > { %v449_v60 = vmax.f32 %v387_v59, 0.0  ;;  %v817_v61 = vpop.f32.mrb[6].mxu0 }
  0xfa   : > { %v402_v63 = vadd.f32 %v817_v61, %v728_v43  ;;  %v396_v0 = vpop.f32.mrb[7].mxu0 }
  0xfb   : > { %868 = vmatprep.mubr.f32.mxu0 %v449_v60  ;;  %v397_v1 = vadd.f32 %v728_v43, %v396_v0 }
  0xfc   : > { %869 = vmatmul.mubr.f32.gmra.mrb[20].mxu0 %v450_v62  ;;  %v452_v4 = vmax.f32 %v402_v63, 0.0 }
  0xfd   : > { %v820_v2 = vpop.f32.mrb[8].mxu0  ;;  %v451_v3 = vmax.f32 %v397_v1, 0.0 }
  0xfe   : > { %v412_v5 = vadd.f32 %v820_v2, %v728_v43  ;;  %v406_v6 = vpop.f32.mrb[9].mxu0 }
  0xff   : > { %v407_v7 = vadd.f32 %v728_v43, %v406_v6  ;;  %871 = vmatprep.mubr.f32.mxu1 %v451_v3 }
 0x100   : > { %872 = vmatmul.mubr.f32.vlgmr.msra.gmra.mrb[0].mxu1 %v452_v4  ;;  %v454_v10 = vmax.f32 %v412_v5, 0.0 }
 0x101   : > { %v453_v8 = vmax.f32 %v407_v7, 0.0  ;;  %v823_v9 = vpop.f32.mrb[10].mxu0 }
 0x102   : > { %v422_v11 = vadd.f32 %v823_v9, %v728_v43  ;;  %v416_v12 = vpop.f32.mrb[11].mxu0 }
 0x103   : > { %v417_v13 = vadd.f32 %v728_v43, %v416_v12  ;;  %874 = vmatprep.mubr.f32.mxu1 %v453_v8 }
 0x104   : > { %875 = vmatmul.mubr.f32.gmra.mrb[2].mxu1 %v454_v10  ;;  %v456_v16 = vmax.f32 %v422_v11, 0.0 }
 0x105   : > { %v455_v14 = vmax.f32 %v417_v13, 0.0  ;;  %v826_v15 = vpop.f32.mrb[12].mxu0 }
 0x106   : > { %v432_v17 = vadd.f32 %v826_v15, %v728_v43  ;;  %v426_v18 = vpop.f32.mrb[13].mxu0 }
 0x107   : > { %v427_v19 = vadd.f32 %v728_v43, %v426_v18  ;;  %877 = vmatprep.mubr.f32.mxu1 %v455_v14 }
 0x108   : > { %878 = vmatmul.mubr.f32.gmra.mrb[4].mxu1 %v456_v16  ;;  %v458_v22 = vmax.f32 %v432_v17, 0.0 }
 0x109   : > { %v457_v20 = vmax.f32 %v427_v19, 0.0  ;;  %v829_v21 = vpop.f32.mrb[14].mxu0 }
 0x10a   : > { %v442_v23 = vadd.f32 %v829_v21, %v728_v43  ;;  %v436_v24 = vpop.f32.mrb[15].mxu0 }
 0x10b   : > { %v437_v25 = vadd.f32 %v728_v43, %v436_v24  ;;  %880 = vmatprep.mubr.f32.mxu1 %v457_v20 }
 0x10c   : > { %881 = vmatmul.mubr.f32.gmra.mrb[6].mxu1 %v458_v22  ;;  %v460_v27 = vmax.f32 %v442_v23, 0.0 }
 0x10d   : > { %v459_v26 = vmax.f32 %v437_v25, 0.0 }
 0x10f   : > { %883 = vmatprep.mubr.f32.mxu1 %v459_v26 }
 0x110   : > { %884 = vmatmul.mubr.f32.gmra.mrb[8].mxu1 %v460_v27 }
 0x1c7   : > { %v864_v29 = vpop.f32.mrb[16].mxu0 }
 0x1c8   : > { %v556_v30 = vadd.f32 %v864_v29, %v745_v28  ;;  %v550_v31 = vpop.f32.mrb[17].mxu0 }
 0x1c9   : > { %v551_v32 = vadd.f32 %v745_v28, %v550_v31 }
 0x1ca   : > { %630 = vst [vmem:[%s1225_s26 + $0x8] sm:$0xff] %v556_v30 }
 0x1cb   : > { %629 = vst [vmem:[%s1225_s26] sm:$0xff] %v551_v32  ;;  %v867_v33 = vpop.f32.mrb[18].mxu0 }
 0x1cc   : > { %v566_v34 = vadd.f32 %v867_v33, %v745_v28  ;;  %v560_v35 = vpop.f32.mrb[19].mxu0 }
 0x1cd   : > { %v561_v36 = vadd.f32 %v745_v28, %v560_v35 }
 0x1ce   : > { %632 = vst [vmem:[%s1225_s26 + $0x18] sm:$0xff] %v566_v34 }
 0x1cf   : > { %631 = vst [vmem:[%s1225_s26 + $0x10] sm:$0xff] %v561_v36  ;;  %v870_v37 = vpop.f32.mrb[20].mxu0 }
 0x1d0   : > { %v576_v38 = vadd.f32 %v870_v37, %v745_v28  ;;  %v570_v39 = vpop.f32.mrb[21].mxu0 }
 0x1d1   : > { %v571_v40 = vadd.f32 %v745_v28, %v570_v39 }
 0x1d2   : > { %634 = vst [vmem:[%s1225_s26 + $0x28] sm:$0xff] %v576_v38 }
 0x1d3   : > { %633 = vst [vmem:[%s1225_s26 + $0x20] sm:$0xff] %v571_v40  ;;  %v873_v41 = vpop.f32.mrb[0].mxu1 }
 0x1d4   : > { %v586_v42 = vadd.f32 %v873_v41, %v745_v28  ;;  %v580_v43 = vpop.f32.mrb[1].mxu1 }
 0x1d5   : > { %v581_v44 = vadd.f32 %v745_v28, %v580_v43 }
 0x1d6   : > { %636 = vst [vmem:[%s1225_s26 + $0x38] sm:$0xff] %v586_v42 }
 0x1d7   : > { %635 = vst [vmem:[%s1225_s26 + $0x30] sm:$0xff] %v581_v44  ;;  %v876_v45 = vpop.f32.mrb[2].mxu1 }
 0x1d8   : > { %v596_v46 = vadd.f32 %v876_v45, %v745_v28  ;;  %v590_v47 = vpop.f32.mrb[3].mxu1 }
 0x1d9   : > { %v591_v48 = vadd.f32 %v745_v28, %v590_v47 }
 0x1da   : > { %638 = vst [vmem:[%s1225_s26 + $0x48] sm:$0xff] %v596_v46 }
 0x1db   : > { %637 = vst [vmem:[%s1225_s26 + $0x40] sm:$0xff] %v591_v48  ;;  %v879_v49 = vpop.f32.mrb[4].mxu1 }
 0x1dc   : > { %v606_v50 = vadd.f32 %v879_v49, %v745_v28  ;;  %v600_v51 = vpop.f32.mrb[5].mxu1 }
 0x1dd   : > { %v601_v52 = vadd.f32 %v745_v28, %v600_v51 }
 0x1de   : > { %640 = vst [vmem:[%s1225_s26 + $0x58] sm:$0xff] %v606_v50 }
 0x1df   : > { %639 = vst [vmem:[%s1225_s26 + $0x50] sm:$0xff] %v601_v52  ;;  %v882_v53 = vpop.f32.mrb[6].mxu1 }
 0x1e0   : > { %v616_v54 = vadd.f32 %v882_v53, %v745_v28  ;;  %v610_v55 = vpop.f32.mrb[7].mxu1 }
 0x1e1   : > { %v611_v56 = vadd.f32 %v745_v28, %v610_v55 }
 0x1e2   : > { %642 = vst [vmem:[%s1225_s26 + $0x68] sm:$0xff] %v616_v54 }
 0x1e3   : > { %641 = vst [vmem:[%s1225_s26 + $0x60] sm:$0xff] %v611_v56  ;;  %v885_v57 = vpop.f32.mrb[8].mxu1 }
 0x1e4   : > { %v626_v58 = vadd.f32 %v885_v57, %v745_v28  ;;  %v620_v59 = vpop.f32.mrb[9].mxu1 }
 0x1e5   : > { %v621_v60 = vadd.f32 %v745_v28, %v620_v59 }
 0x1e6   : > { %644 = vst [vmem:[%s1225_s26 + $0x78] sm:$0xff] %v626_v58 }
 0x1e7   : > { %643 = vst [vmem:[%s1225_s26 + $0x70] sm:$0xff] %v621_v60 }
 0x1e8   : > { %992 = shalt.err (!%p989_p3)
}
 0x1e9   : > { %s993_s15 = scalar_lea.hbm %s1246_s9, 2048  ;;  %s997_s17 = scalar_lea.hbm %s1300_s5, 4096 }
 0x1ea   : > { %p994_p4 = scmp.ne.s32.totalorder %s1246_s9, %s993_s15  ;;  %p998_p9 = scmp.lt.u32.totalorder %s1246_s9, %s1300_s5 }
 0x1eb   : > { %p999_p10 = scmp.lt.u32.totalorder %s997_s17, %s993_s15  ;;  %p1001_p12 = scmp.lt.u32.totalorder %s993_s15, %s1246_s9 }
 0x1ec   : > { %p995_p7 = pnand %p994_p4, %p1114_p5 }
 0x1ed   : > { %p1000_p11 = por %p999_p10, %p998_p9 }
 0x1ee   : > { %p996_p8 = pneg %p995_p7 }
 0x1ef   : > { %p1002_p13 = por %p1001_p12, %p1000_p11 }
 0x1f1   : > { %p1003_p0 = pnand %p1002_p13, %p996_p8 }
 0x1f3   : > { %1006 = shalt.err (!%p1003_p0)
}
 0x1f4   : > { %s1044_s26 = smov 128   ;;  %s1045_s6 = smov 8  }
 0x1f5   : > { %938 = dma.vmem_to_hbm [thread:$0]  (%p1114_p5), %s1248_s7, 2048, %s1246_s9, %s1254_s22, %s1044_s26, %s1044_s26, %s1045_s6  }
 0x1f6 PF: > { %p944_p1 = scmp.ge.s32.totalorder %s1041_s21, 2  ;;  %s674_s8 = sand.u32 1, %s1029_s18  }
 0x1f7   : > { %s675_s10 = scalar_lea.sflag [#allocation3], %s674_s8 }
 0x1f8   : > { %p941_p2 = pnand %p944_p1, %p1118_p6 }
 0x1fa   : > { %1024 = dma.done.wait (!%p941_p2), %s675_s10, 2048  }
 0x1fb   : > { %1026 = vsyncadd (!%p941_p2), %s675_s10, 4294965248  ;;  %p15_p3 = scmp.ge.s32.totalorder %s1101_s24, 4   ;;  %s1303_s18 = smov %s1033_s19 }
 0x1fc   : > { %s1304_s19 = smov %s1037_s20  ;;  %s1305_s20 = smov %s1112_s27 }
 0x1fd   : > { %s1306_s21 = smov %s1101_s24  ;;  %17 = sbr.rel (!%p15_p3) target bundleno = 3 (0x3), region = 75 }
 0x204   :  { %680 = vsyncpa [#allocation3], 1 }
 0x205   :  { %682 = vsyncpa [#allocation3 + $0x1], 1 }

</bundles_post_ra>
